<compile_context>
chip_gen: v6e
topology: v6e:2x2x1
jax: 0.10.0
libtpu: 0.0.40
codegen_flags: <defaults>
</compile_context>

<pallas_src>
import jax
import jax.numpy as jnp
from jax.experimental import pallas as pl
from jax.experimental.pallas import tpu as pltpu


def _round_up(n: int, m: int) -> int:
    return ((n + m - 1) // m) * m


# ----------------------------------------------------------------------------- kernel


def taskhead_kernel(x_ref, w1_ref, b1_ref, w2_ref, b2_ref, o_ref):
    # Cast activations to the (bf16) weight dtype right before the MXU op; x travels
    # HBM->VMEM once in its native dtype (no wrapper-side pad/cast copy).
    x = x_ref[...].astype(w1_ref.dtype)
    # fc1: (tile_b, D_in) @ (D_in, Pp) on the MXU, f32 accumulation.
    h = jnp.dot(x, w1_ref[...], preferred_element_type=jnp.float32)
    h = h + b1_ref[...]                                   # f32 bias add (VPU)
    # SiLU(h) = h * sigmoid(h); sigmoid via a single EUP tanh (stable for large |h|).
    h = h * (0.5 * jnp.tanh(0.5 * h) + 0.5)
    # classifier: explicit downcast of activations for the MXU, f32 accumulation.
    out = jnp.dot(h.astype(w2_ref.dtype), w2_ref[...],
                  preferred_element_type=jnp.float32)
    out = out + b2_ref[...]                               # f32 bias add
    o_ref[...] = out.astype(o_ref.dtype)


# ------------------------------------------------------------------- params (one-time)


def prepare_params(w1, b1, w2, b2, matmul_dtype=jnp.bfloat16):
    """Pad hidden/class dims to multiples of 128 and cast ONCE at init.

    w1: (D_in, P)  [in, out] layout (transposed vs. torch nn.Linear.weight)
    b1: (P,) or (1, P);  w2: (P, C);  b2: (C,) or (1, C)  (1-D biases accepted,
    matching PyTorch nn.Linear).

    D_in is deliberately NOT padded: x keeps its true feature dim so the kernel can
    consume it directly.  Zero padding is exact: padded hidden lanes get bias 0 ->
    SiLU(0) = 0 and padded w2 rows are zero; padded class columns are sliced off.
    """
    if b1.ndim == 1:
        b1 = b1[None, :]
    if b2.ndim == 1:
        b2 = b2[None, :]
    _, P = w1.shape
    C = w2.shape[1]
    Pp = _round_up(P, 128)
    Cp = _round_up(C, 128)
    w1p = jnp.pad(w1, ((0, 0), (0, Pp - P))).astype(matmul_dtype)
    w2p = jnp.pad(w2, ((0, Pp - P), (0, Cp - C))).astype(matmul_dtype)
    b1p = jnp.pad(b1, ((0, 0), (0, Pp - P))).astype(jnp.float32)
    b2p = jnp.pad(b2, ((0, 0), (0, Cp - C))).astype(jnp.float32)
    return w1p, b1p, w2p, b2p


# ----------------------------------------------------------------------- tile / budget


def _vmem_budget_bytes() -> int:
    """Generation-aware VMEM cap: ~85% of physical (headroom for Mosaic scratch).
    ~54 MiB on v7x (64 MiB physical), ~108 MiB on v5e/v6e (128 MiB physical)."""
    try:
        phys = int(pltpu.get_tpu_info().vmem_capacity_bytes)
    except Exception:
        phys = 64 << 20  # conservative default = v7x per-TC VMEM
    return int(phys * 0.85)


def _choose_tile_b(B, D_in, Pp, Cp, x_isz, w_isz, out_isz, budget) -> int:
    """Pick the largest batch tile that fits the VMEM budget (multiple of 16 for bf16
    sublane packing), capped at 2048 and at ceil(B/2) so n_tiles >= 2 (v7x megacore)."""
    resident = D_in * Pp * w_isz + Pp * Cp * w_isz + (Pp + Cp) * 4
    per_row = (2 * D_in * x_isz          # double-buffered x tile
               + 2 * Cp * out_isz        # double-buffered output tile
               + Pp * (4 + w_isz)        # f32 hidden + bf16 downcast temp
               + Cp * 4)                 # f32 logits temp
    avail = budget - 2 * resident - (4 << 20)   # margin (weights may be double-buffered)
    tile_b = max(16, min(2048, avail // max(per_row, 1)))
    tile_b = (tile_b // 16) * 16
    if B < 32:
        return _round_up(max(B, 1), 8)
    two_way = _round_up(-(-B // 2), 16)  # keep >= 2 grid steps for the 2 v7x TCs
    return max(16, min(int(tile_b), two_way))


# ------------------------------------------------------------------------------ forward


def _pallas_forward(x, w1p, b1p, w2p, b2p, tile_b, vmem_limit, single_buffer_weights):
    B, D_in = x.shape
    Pp = w1p.shape[1]
    Cp = w2p.shape[1]
    n_tiles = pl.cdiv(B, tile_b)
    # Pinned operands (constant index_map) need only one VMEM copy.
    pinned = dict(pipeline_mode=pl.Buffered(1)) if single_buffer_weights else {}
    return pl.pallas_call(
        taskhead_kernel,
        out_shape=jax.ShapeDtypeStruct((B, Cp), x.dtype),
        grid=(n_tiles,),
        in_specs=[
            pl.BlockSpec((tile_b, D_in), lambda i: (i, 0)),          # x: tiled over batch
            pl.BlockSpec((D_in, Pp), lambda i: (0, 0), **pinned),    # w1: pinned / resident
            pl.BlockSpec((1, Pp), lambda i: (0, 0), **pinned),       # b1: pinned
            pl.BlockSpec((Pp, Cp), lambda i: (0, 0), **pinned),      # w2: pinned
            pl.BlockSpec((1, Cp), lambda i: (0, 0), **pinned),       # b2: pinned
        ],
        out_specs=pl.BlockSpec((tile_b, Cp), lambda i: (i, 0)),
        compiler_params=pltpu.CompilerParams(
            dimension_semantics=("parallel",),
            vmem_limit_bytes=vmem_limit,
        ),
    )(x, w1p, b1p, w2p, b2p)


def task_head_forward(x, w1p, b1p, w2p, b2p, num_classes=None, *,
                      tile_b=None, force_pallas=False):
    """TaskHead forward: fc1 -> SiLU -> classifier (dropout=0.0 => Identity).

    Expects weights already processed by `prepare_params` (padded + cast once).
    x: (B, D_in); returns (B, num_classes) in x.dtype.
    """
    B, D_in = x.shape
    assert w1p.shape[0] == D_in, "w1 must be laid out (D_in, P)"
    Pp = w1p.shape[1]
    Cp = w2p.shape[1]
    C = Cp if num_classes is None else int(num_classes)

    # Tiny batches: the fused XLA dot chain beats pallas_call fixed overhead.
    if not force_pallas and B < 256:
        h = jnp.dot(x.astype(w1p.dtype), w1p, preferred_element_type=jnp.float32) + b1p
        h = h * (0.5 * jnp.tanh(0.5 * h) + 0.5)
        out = jnp.dot(h.astype(w2p.dtype), w2p, preferred_element_type=jnp.float32) + b2p
        return out[:, :C].astype(x.dtype)

    budget = _vmem_budget_bytes()
    if tile_b is None:
        tile_b = _choose_tile_b(B, D_in, Pp, Cp,
                                jnp.dtype(x.dtype).itemsize,
                                jnp.dtype(w1p.dtype).itemsize,
                                jnp.dtype(x.dtype).itemsize,
                                budget)
    try:
        out = _pallas_forward(x, w1p, b1p, w2p, b2p, tile_b, budget, True)
    except Exception:
        # pl.Buffered(1) (single-buffered pinned weights) not supported on this
        # jax build -> fall back to default double-buffered weight specs.
        out = _pallas_forward(x, w1p, b1p, w2p, b2p, tile_b, budget, False)
    return out if Cp == C else out[:, :C]


# --------------------------------------------------------------------------- reference


def init_params(key, input_size, projection_size, num_classes, dtype=jnp.float32):
    """Deterministic init mimicking nn.Linear default (uniform +-1/sqrt(fan_in)).
    Biases are 1-D, matching PyTorch nn.Linear."""
    k1, k2, k3, k4 = jax.random.split(key, 4)
    lim1 = 1.0 / (input_size ** 0.5)
    lim2 = 1.0 / (projection_size ** 0.5)
    w1 = jax.random.uniform(k1, (input_size, projection_size), dtype, -lim1, lim1)
    b1 = jax.random.uniform(k2, (projection_size,), dtype, -lim1, lim1)
    w2 = jax.random.uniform(k3, (projection_size, num_classes), dtype, -lim2, lim2)
    b2 = jax.random.uniform(k4, (num_classes,), dtype, -lim2, lim2)
    return w1, b1, w2, b2


def reference_forward(x, w1, b1, w2, b2):
    h = x @ w1 + b1
    h = h * jax.nn.sigmoid(h)
    return h @ w2 + b2


if __name__ == "__main__":
    # Shapes consistent with the module: batch=8, input_size=32,
    # projection_size=64, num_classes=16; dropout=0.0 -> Identity (no-op).
    batch, input_size, projection_size, num_classes = 8, 32, 64, 16

    key = jax.random.PRNGKey(0)
    kx, kp = jax.random.split(key)
    x = jax.random.normal(kx, (batch, input_size), jnp.float32)
    w1, b1, w2, b2 = init_params(kp, input_size, projection_size, num_classes)

    # Pad + cast the static weights ONCE (not per forward call).
    params = prepare_params(w1, b1, w2, b2)

    # force_pallas=True so the Pallas kernel path (not the tiny-shape XLA fallback)
    # is exercised at this small test size.
    out = task_head_forward(x, *params, num_classes=num_classes, force_pallas=True)
    out = jax.block_until_ready(out)

    ref = reference_forward(x, w1, b1, w2, b2)
    assert out.shape == (batch, num_classes)
    assert bool(jnp.isfinite(out).all())
    # bf16 matmul inputs vs. f32 reference (sigmoid is exact now) => modest tolerance.
    assert jnp.allclose(out, ref, atol=2e-2, rtol=2e-2), "mismatch vs reference"

    print("KERNEL_OK")
</pallas_src>

<mosaic_0001>
module attributes {stable_mosaic.version = 11 : i64} {
  func.func @taskhead_kernel(%arg0: i32, %arg1: memref<8x32xf32, #tpu.memory_space<vmem>>, %arg2: memref<32x128xbf16, #tpu.memory_space<vmem>>, %arg3: memref<1x128xf32, #tpu.memory_space<vmem>>, %arg4: memref<128x128xbf16, #tpu.memory_space<vmem>>, %arg5: memref<1x128xf32, #tpu.memory_space<vmem>>, %arg6: memref<8x128xf32, #tpu.memory_space<vmem>>) attributes {dimension_semantics = [#tpu.dimension_semantics<parallel>], iteration_bounds = array<i64: 1>, scalar_prefetch = 0 : i64, scratch_operands = 0 : i64, tpu.core_type = #tpu.core_type<tc>, window_params = [{transform_indices = @transform_0, window_bounds = array<i64: 8, 32>}, {pipeline_mode = #tpu.pipeline_mode<synchronous>, transform_indices = @transform_1, window_bounds = array<i64: 32, 128>}, {pipeline_mode = #tpu.pipeline_mode<synchronous>, transform_indices = @transform_2, window_bounds = array<i64: 1, 128>}, {pipeline_mode = #tpu.pipeline_mode<synchronous>, transform_indices = @transform_3, window_bounds = array<i64: 128, 128>}, {pipeline_mode = #tpu.pipeline_mode<synchronous>, transform_indices = @transform_4, window_bounds = array<i64: 1, 128>}, {transform_indices = @transform_5, window_bounds = array<i64: 8, 128>}]} {
    %c0 = arith.constant 0 : index
    %c0_0 = arith.constant 0 : index
    %0 = vector.load %arg1[%c0, %c0_0] : memref<8x32xf32, #tpu.memory_space<vmem>>, vector<8x32xf32>
    %1 = arith.truncf %0 : vector<8x32xf32> to vector<8x32xbf16>
    %c0_1 = arith.constant 0 : index
    %c0_2 = arith.constant 0 : index
    %2 = vector.load %arg2[%c0_1, %c0_2] : memref<32x128xbf16, #tpu.memory_space<vmem>>, vector<32x128xbf16>
    %cst = arith.constant dense<0.000000e+00> : vector<8x128xf32>
    %3 = tpu.matmul %1, %2, %cst {dimension_numbers = #tpu.dot_dimension_numbers<[1], [0], [0], [1], [0, 0, 1, 1], [], []>} : vector<8x32xbf16>, vector<32x128xbf16>, vector<8x128xf32> -> vector<8x128xf32>
    %c0_3 = arith.constant 0 : index
    %c0_4 = arith.constant 0 : index
    %4 = vector.load %arg3[%c0_3, %c0_4] : memref<1x128xf32, #tpu.memory_space<vmem>>, vector<1x128xf32>
    %5 = vector.broadcast %4 : vector<1x128xf32> to vector<8x128xf32>
    %6 = arith.addf %3, %5 : vector<8x128xf32>
    %cst_5 = arith.constant 5.000000e-01 : f32
    %7 = vector.broadcast %cst_5 : f32 to vector<8x128xf32>
    %8 = arith.mulf %7, %6 : vector<8x128xf32>
    %9 = math.tanh %8 : vector<8x128xf32>
    %cst_6 = arith.constant 5.000000e-01 : f32
    %10 = vector.broadcast %cst_6 : f32 to vector<8x128xf32>
    %11 = arith.mulf %10, %9 : vector<8x128xf32>
    %cst_7 = arith.constant 5.000000e-01 : f32
    %12 = vector.broadcast %cst_7 : f32 to vector<8x128xf32>
    %13 = arith.addf %11, %12 : vector<8x128xf32>
    %14 = arith.mulf %6, %13 : vector<8x128xf32>
    %15 = arith.truncf %14 : vector<8x128xf32> to vector<8x128xbf16>
    %c0_8 = arith.constant 0 : index
    %c0_9 = arith.constant 0 : index
    %16 = vector.load %arg4[%c0_8, %c0_9] : memref<128x128xbf16, #tpu.memory_space<vmem>>, vector<128x128xbf16>
    %cst_10 = arith.constant dense<0.000000e+00> : vector<8x128xf32>
    %17 = tpu.matmul %15, %16, %cst_10 {dimension_numbers = #tpu.dot_dimension_numbers<[1], [0], [0], [1], [0, 0, 1, 1], [], []>} : vector<8x128xbf16>, vector<128x128xbf16>, vector<8x128xf32> -> vector<8x128xf32>
    %c0_11 = arith.constant 0 : index
    %c0_12 = arith.constant 0 : index
    %18 = vector.load %arg5[%c0_11, %c0_12] : memref<1x128xf32, #tpu.memory_space<vmem>>, vector<1x128xf32>
    %19 = vector.broadcast %18 : vector<1x128xf32> to vector<8x128xf32>
    %20 = arith.addf %17, %19 : vector<8x128xf32>
    %c0_13 = arith.constant 0 : index
    %c0_14 = arith.constant 0 : index
    %21 = vector.load %arg6[%c0_13, %c0_14] : memref<8x128xf32, #tpu.memory_space<vmem>>, vector<8x128xf32>
    tpu.vector_store %arg6[%c0_13, %c0_14], %20 {strides = array<i32>} : memref<8x128xf32, #tpu.memory_space<vmem>>, vector<8x128xf32>,
    return
  }
  func.func @transform_0(%arg0: i32) -> (i32, i32) {
    %c0_i32 = arith.constant 0 : i32
    %c0_i32_0 = arith.constant 0 : i32
    return %arg0, %c0_i32 : i32, i32
  }
  func.func @transform_1(%arg0: i32) -> (i32, i32) {
    %c0_i32 = arith.constant 0 : i32
    %c0_i32_0 = arith.constant 0 : i32
    %c0_i32_1 = arith.constant 0 : i32
    return %c0_i32, %c0_i32_0 : i32, i32
  }
  func.func @transform_2(%arg0: i32) -> (i32, i32) {
    %c0_i32 = arith.constant 0 : i32
    %c0_i32_0 = arith.constant 0 : i32
    %c0_i32_1 = arith.constant 0 : i32
    return %c0_i32, %c0_i32_0 : i32, i32
  }
  func.func @transform_3(%arg0: i32) -> (i32, i32) {
    %c0_i32 = arith.constant 0 : i32
    %c0_i32_0 = arith.constant 0 : i32
    %c0_i32_1 = arith.constant 0 : i32
    return %c0_i32, %c0_i32_0 : i32, i32
  }
  func.func @transform_4(%arg0: i32) -> (i32, i32) {
    %c0_i32 = arith.constant 0 : i32
    %c0_i32_0 = arith.constant 0 : i32
    %c0_i32_1 = arith.constant 0 : i32
    return %c0_i32, %c0_i32_0 : i32, i32
  }
  func.func @transform_5(%arg0: i32) -> (i32, i32) {
    %c0_i32 = arith.constant 0 : i32
    %c0_i32_0 = arith.constant 0 : i32
    return %arg0, %c0_i32 : i32, i32
  }
}

module attributes {stable_mosaic.version = 11 : i64} {
  func.func @taskhead_kernel(%arg0: i32, %arg1: memref<8x32xf32, #tpu.memory_space<vmem>>, %arg2: memref<32x128xbf16, #tpu.memory_space<vmem>>, %arg3: memref<1x128xf32, #tpu.memory_space<vmem>>, %arg4: memref<128x128xbf16, #tpu.memory_space<vmem>>, %arg5: memref<1x128xf32, #tpu.memory_space<vmem>>, %arg6: memref<8x128xf32, #tpu.memory_space<vmem>>) attributes {dimension_semantics = [#tpu.dimension_semantics<parallel>], iteration_bounds = array<i64: 1>, scalar_prefetch = 0 : i64, scratch_operands = 0 : i64, tpu.core_type = #tpu.core_type<tc>, window_params = [{transform_indices = @transform_0, window_bounds = array<i64: 8, 32>}, {pipeline_mode = #tpu.pipeline_mode<synchronous>, transform_indices = @transform_1, window_bounds = array<i64: 32, 128>}, {pipeline_mode = #tpu.pipeline_mode<synchronous>, transform_indices = @transform_2, window_bounds = array<i64: 1, 128>}, {pipeline_mode = #tpu.pipeline_mode<synchronous>, transform_indices = @transform_3, window_bounds = array<i64: 128, 128>}, {pipeline_mode = #tpu.pipeline_mode<synchronous>, transform_indices = @transform_4, window_bounds = array<i64: 1, 128>}, {transform_indices = @transform_5, window_bounds = array<i64: 8, 128>}]} {
    %c0 = arith.constant 0 : index
    %c0_0 = arith.constant 0 : index
    %0 = vector.load %arg1[%c0, %c0_0] : memref<8x32xf32, #tpu.memory_space<vmem>>, vector<8x32xf32>
    %1 = arith.truncf %0 : vector<8x32xf32> to vector<8x32xbf16>
    %c0_1 = arith.constant 0 : index
    %c0_2 = arith.constant 0 : index
    %2 = vector.load %arg2[%c0_1, %c0_2] : memref<32x128xbf16, #tpu.memory_space<vmem>>, vector<32x128xbf16>
    %cst = arith.constant dense<0.000000e+00> : vector<8x128xf32>
    %3 = tpu.matmul %1, %2, %cst {dimension_numbers = #tpu.dot_dimension_numbers<[1], [0], [0], [1], [0, 0, 1, 1], [], []>} : vector<8x32xbf16>, vector<32x128xbf16>, vector<8x128xf32> -> vector<8x128xf32>
    %c0_3 = arith.constant 0 : index
    %c0_4 = arith.constant 0 : index
    %4 = vector.load %arg3[%c0_3, %c0_4] : memref<1x128xf32, #tpu.memory_space<vmem>>, vector<1x128xf32>
    %5 = vector.broadcast %4 : vector<1x128xf32> to vector<8x128xf32>
    %6 = arith.addf %3, %5 : vector<8x128xf32>
    %cst_5 = arith.constant 5.000000e-01 : f32
    %7 = vector.broadcast %cst_5 : f32 to vector<8x128xf32>
    %8 = arith.mulf %7, %6 : vector<8x128xf32>
    %9 = math.tanh %8 : vector<8x128xf32>
    %cst_6 = arith.constant 5.000000e-01 : f32
    %10 = vector.broadcast %cst_6 : f32 to vector<8x128xf32>
    %11 = arith.mulf %10, %9 : vector<8x128xf32>
    %cst_7 = arith.constant 5.000000e-01 : f32
    %12 = vector.broadcast %cst_7 : f32 to vector<8x128xf32>
    %13 = arith.addf %11, %12 : vector<8x128xf32>
    %14 = arith.mulf %6, %13 : vector<8x128xf32>
    %15 = arith.truncf %14 : vector<8x128xf32> to vector<8x128xbf16>
    %c0_8 = arith.constant 0 : index
    %c0_9 = arith.constant 0 : index
    %16 = vector.load %arg4[%c0_8, %c0_9] : memref<128x128xbf16, #tpu.memory_space<vmem>>, vector<128x128xbf16>
    %cst_10 = arith.constant dense<0.000000e+00> : vector<8x128xf32>
    %17 = tpu.matmul %15, %16, %cst_10 {dimension_numbers = #tpu.dot_dimension_numbers<[1], [0], [0], [1], [0, 0, 1, 1], [], []>} : vector<8x128xbf16>, vector<128x128xbf16>, vector<8x128xf32> -> vector<8x128xf32>
    %c0_11 = arith.constant 0 : index
    %c0_12 = arith.constant 0 : index
    %18 = vector.load %arg5[%c0_11, %c0_12] : memref<1x128xf32, #tpu.memory_space<vmem>>, vector<1x128xf32>
    %19 = vector.broadcast %18 : vector<1x128xf32> to vector<8x128xf32>
    %20 = arith.addf %17, %19 : vector<8x128xf32>
    %c0_13 = arith.constant 0 : index
    %c0_14 = arith.constant 0 : index
    %21 = vector.load %arg6[%c0_13, %c0_14] : memref<8x128xf32, #tpu.memory_space<vmem>>, vector<8x128xf32>
    tpu.vector_store %arg6[%c0_13, %c0_14], %20 {strides = array<i32>} : memref<8x128xf32, #tpu.memory_space<vmem>>, vector<8x128xf32>,
    return
  }
  func.func @transform_0(%arg0: i32) -> (i32, i32) {
    %c0_i32 = arith.constant 0 : i32
    %c0_i32_0 = arith.constant 0 : i32
    return %arg0, %c0_i32 : i32, i32
  }
  func.func @transform_1(%arg0: i32) -> (i32, i32) {
    %c0_i32 = arith.constant 0 : i32
    %c0_i32_0 = arith.constant 0 : i32
    %c0_i32_1 = arith.constant 0 : i32
    return %c0_i32, %c0_i32_0 : i32, i32
  }
  func.func @transform_2(%arg0: i32) -> (i32, i32) {
    %c0_i32 = arith.constant 0 : i32
    %c0_i32_0 = arith.constant 0 : i32
    %c0_i32_1 = arith.constant 0 : i32
    return %c0_i32, %c0_i32_0 : i32, i32
  }
  func.func @transform_3(%arg0: i32) -> (i32, i32) {
    %c0_i32 = arith.constant 0 : i32
    %c0_i32_0 = arith.constant 0 : i32
    %c0_i32_1 = arith.constant 0 : i32
    return %c0_i32, %c0_i32_0 : i32, i32
  }
  func.func @transform_4(%arg0: i32) -> (i32, i32) {
    %c0_i32 = arith.constant 0 : i32
    %c0_i32_0 = arith.constant 0 : i32
    %c0_i32_1 = arith.constant 0 : i32
    return %c0_i32, %c0_i32_0 : i32, i32
  }
  func.func @transform_5(%arg0: i32) -> (i32, i32) {
    %c0_i32 = arith.constant 0 : i32
    %c0_i32_0 = arith.constant 0 : i32
    return %arg0, %c0_i32 : i32, i32
  }
}

</mosaic_0001>

<bundles_post_ra>
// kernel: tpu_custom_call.1
= control target key start
LH: loop header
LB: loop body
LE: loop exit
PB: predicated region body
PF: predicated region fallthrough
CT: control target
= control target key end

     0   :  { %10 = vsyncpa [#allocation3], 0  ;;  %s479_s0 = inlined_call_operand.hbm [shape: f32[8,32], index: 0, kind: input, shape index: {}]   ;;  %s480_s1 = inlined_call_operand.hbm [shape: bf16[32,128], index: 1, kind: input, shape index: {}]   ;;  %s481_s2 = inlined_call_operand.vmem [shape: f32[1,128], index: 2, kind: input, shape index: {}]   ;;  %s482_s3 = inlined_call_operand.hbm [shape: bf16[128,128], index: 3, kind: input, shape index: {}]   ;;  %s483_s4 = inlined_call_operand.vmem [shape: f32[1,128], index: 4, kind: input, shape index: {}]   ;;  %s484_s5 = inlined_call_operand.hbm [shape: f32[8,128], index: 5, kind: output, shape index: {}]  }
   0x1   :  { %11 = vsyncpa [#allocation6], 0 }
   0x2   :  { %12 = vsyncpa [#allocation4], 0  ;;  %s423_s18 = smov [#allocation5]  }
   0x3   :  { %s28_s19 = sshll.u32 %s423_s18, 4  ;;  %s29_s19 = int_to_ptr.vmem [resolvable:$true] %s28_s19 }
   0x4   :  { %s345_s20 = scalar_lea.vmem %s29_s19, 256  ;;  %p350_p1 = scmp.lt.s32.totalorder %s29_s19, %s29_s19 }
   0x5   :  { %p346_p0 = scmp.ne.s32.totalorder %s29_s19, %s345_s20  ;;  %p351_p2 = scmp.lt.s32.totalorder %s345_s20, %s345_s20 }
   0x7   :  { %p352_p3 = por %p351_p2, %p350_p1 }
   0x9   :  { %p353_p4 = pnand %p352_p3, %p346_p0 }
   0xb   :  { %356 = shalt.err (!%p353_p4)
}
   0xc   :  { %s424_s21 = smov 64   ;;  %s425_s22 = smov 4  }
   0xd   :  { %34 = dma.hbm_to_vmem [thread:$0]  %s480_s1, 256, %s29_s19, [#allocation6], %s424_s21, %s424_s21, %s425_s22  }
   0xe   :  { %s426_s25 = smov [#allocation2]   ;;  %s427_s27 = smov [#allocation7]  }
   0xf   :  { %s19_s26 = sshll.u32 %s426_s25, 4  ;;  %s42_s28 = sshll.u32 %s427_s27, 4  ;;  %s20_s26 = int_to_ptr.vmem [resolvable:$true] %s19_s26  ;;  %s43_s28 = int_to_ptr.vmem [resolvable:$true] %s42_s28 }
  0x10   :  { %s365_s29 = scalar_lea.vmem %s20_s26, 128  ;;  %p370_p6 = scmp.lt.s32.totalorder %s20_s26, %s20_s26 }
  0x11   :  { %p366_p5 = scmp.ne.s32.totalorder %s20_s26, %s365_s29  ;;  %p371_p7 = scmp.lt.s32.totalorder %s365_s29, %s365_s29 }
  0x13   :  { %p372_p8 = por %p371_p7, %p370_p6 }
  0x15   :  { %p373_p9 = pnand %p372_p8, %p366_p5 }
  0x17   :  { %376 = shalt.err (!%p373_p9)
}
  0x18   :  { %22 = dma.hbm_to_vmem [thread:$0]  %s479_s0, 128, %s20_s26, [#allocation3]  }
  0x19   :  { %s385_s7 = scalar_lea.vmem %s43_s28, 1024  ;;  %p390_p11 = scmp.lt.s32.totalorder %s43_s28, %s43_s28 }
  0x1a   :  { %p386_p10 = scmp.ne.s32.totalorder %s43_s28, %s385_s7  ;;  %p391_p12 = scmp.lt.s32.totalorder %s385_s7, %s385_s7 }
  0x1c   :  { %p392_p13 = por %p391_p12, %p390_p11 }
  0x1e   :  { %p393_p0 = pnand %p392_p13, %p386_p10 }
  0x20   :  { %396 = shalt.err (!%p393_p0)
}
  0x21   :  { %48 = dma.hbm_to_vmem [thread:$0]  %s482_s3, 1024, %s43_s28, [#allocation6], %s424_s21, %s424_s21, %s425_s22  }
  0x22   :  { %417 = dma.done.wait [#allocation3], 128  }
  0x23   :  { %418 = vsyncadd [#allocation3], 4294967168 }
  0x24   :  { %419 = dma.done.wait [#allocation6], 1280  }
  0x25   :  { %420 = vsyncadd [#allocation6], 4294966016  ;;  %v428_v0 = vmov 0.0   ;;  %vm429_vm0 = vmmov 0   ;;  %v325_v1 = vld [vmem:[#allocation5 + $0x8] sm:$0xff]   ;;  %v326_v2 = vld [vmem:[#allocation5] sm:$0xff]  }
  0x26   :  { %289 = vmatprep.subr.bf16.mxu0 %v428_v0  ;;  %293 = vmatprep.mubr.msk.bf16.mxu0 %vm429_vm0, %v428_v0  ;;  %v61_v3 = vld [vmem:[#allocation2] sm:$0xff]  ;;  %vm86_vm1 = vcmask 261120   ;;  %v327_v4 = vld [vmem:[#allocation7 + $0x38] sm:$0xff]   ;;  %v328_v6 = vld [vmem:[#allocation7 + $0x30] sm:$0xff]   ;;  %s430_s11 = smov [#allocation8]  }
  0x27   :  { %297 = vmatprep.subr.bf16.mxu1 %v428_v0  ;;  %313 = vmatprep.mubr.msk.bf16.mxu1 %vm429_vm0, %v428_v0  ;;  %v62_v5 = vpack.c.bf16 %v61_v3, %v61_v3  ;;  %v329_v7 = vld [vmem:[#allocation7 + $0x28] sm:$0xff]   ;;  %v330_v8 = vld [vmem:[#allocation7 + $0x20] sm:$0xff]   ;;  %v331_v9 = vld [vmem:[#allocation7 + $0x18] sm:$0xff]   ;;  %s254_s12 = sshll.u32 %s430_s11, 4  ;;  %s255_s12 = int_to_ptr.vmem [resolvable:$true] %s254_s12 }
  0x28   :  { %290 = vmatpush3.bf16.msra.mxu0 %v325_v1  ;;  %298 = vmatpush3.bf16.msra.mxu1 %v327_v4  ;;  %v332_v10 = vld [vmem:[#allocation7 + $0x10] sm:$0xff]   ;;  %v333_v11 = vld [vmem:[#allocation7 + $0x8] sm:$0xff]   ;;  %v334_v12 = vld [vmem:[#allocation7] sm:$0xff]   ;;  %p402_p2 = scmp.lt.s32.totalorder %s255_s12, %s255_s12 }
  0x29   :  { %291 = vmatprep.subr.bf16.mxu0 %v428_v0  ;;  %299 = vmatprep.subr.bf16.mxu1 %v428_v0  ;;  %v264_v13 = vld [vmem:[%s481_s2] ss:$0 sm:$0xff]  ;;  %s397_s2 = scalar_lea.vmem %s255_s12, 128 }
  0x2a   :  { %v268_v25 = vld [vmem:[%s483_s4] ss:$0 sm:$0xff]  ;;  %p398_p1 = scmp.ne.s32.totalorder %s255_s12, %s397_s2  ;;  %p403_p3 = scmp.lt.s32.totalorder %s397_s2, %s397_s2 }
  0x2c   :  { %292 = vmatpush3.bf16.msra.mxu0 %v326_v2  ;;  %300 = vmatpush3.bf16.msra.mxu1 %v328_v6  ;;  %p404_p4 = por %p403_p3, %p402_p2 }
  0x2d   :  { %301 = vmatprep.subr.bf16.mxu1 %v428_v0 }
  0x2e   :  { %p405_p5 = pnand %p404_p4, %p398_p1 }
  0x2f   :  { %294 = vmatmul.mubr.msk.bf16.vlgmr.msra.gmra.mxu0 %vm86_vm1, %v62_v5 }
  0x30   :  { %302 = vmatpush3.bf16.msra.mxu1 %v329_v7 }
  0x31   :  { %303 = vmatprep.subr.bf16.mxu1 %v428_v0 }
  0x34   :  { %304 = vmatpush3.bf16.msra.mxu1 %v330_v8 }
  0x35   :  { %305 = vmatprep.subr.bf16.mxu1 %v428_v0 }
  0x38   :  { %306 = vmatpush3.bf16.msra.mxu1 %v331_v9 }
  0x39   :  { %307 = vmatprep.subr.bf16.mxu1 %v428_v0 }
  0x3c   :  { %308 = vmatpush3.bf16.msra.mxu1 %v332_v10 }
  0x3d   :  { %309 = vmatprep.subr.bf16.mxu1 %v428_v0 }
  0x40   :  { %310 = vmatpush3.bf16.msra.mxu1 %v333_v11 }
  0x41   :  { %311 = vmatprep.subr.bf16.mxu1 %v428_v0 }
  0x44   :  { %312 = vmatpush3.bf16.msra.mxu1 %v334_v12 }
  0xef   :  { %v124_v14 = vpop.f32.mrf.mxu0 }
  0xf0   :  { %v125_v15 = vadd.f32 %v264_v13, %v124_v14 }
  0xf1   :  { %v295_v16 = vpop.f32.mrf.mxu0 }
  0xf2   :  { %v130_v17 = vmul.f32 0.5, %v125_v15 }
  0xf3   :  { %v127_v18 = vpop.f32.mrf.mxu0 }
  0xf4   :  { %335 = vtanh.f32 %v130_v17 }
  0xf5   :  { %v296_v19 = vpop.f32.mrf.mxu0 }
 0x101   :  { %v336_v20 = vpop.eup %335 }
 0x102   :  { %v132_v21 = vmul.f32 0.5, %v336_v20 }
 0x104   :  { %v133_v22 = vadd.f32 0.5, %v132_v21 }
 0x106   :  { %v134_v23 = vmul.f32 %v133_v22, %v125_v15 }
 0x108   :  { %v135_v24 = vpack.c.bf16 %v134_v23, %v134_v23 }
 0x10a   :  { %314 = vmatmul.mubr.bf16.vlgmr.msra.gmra.mxu1 %v135_v24 }
 0x1ca   :  { %v241_v26 = vpop.f32.mrf.mxu1 }
 0x1cb   :  { %v242_v27 = vadd.f32 %v268_v25, %v241_v26 }
 0x1cc   :  { %v315_v28 = vpop.f32.mrf.mxu1 }
 0x1cd   :  { %247 = vst [vmem:[#allocation8] sm:$0xff] %v242_v27 }
 0x1ce   :  { %v244_v29 = vpop.f32.mrf.mxu1 }
 0x1cf   :  { %408 = shalt.err (!%p405_p5)
}
 0x1d0   :  { %257 = dma.vmem_to_hbm [thread:$0]  %s255_s12, 128, %s484_s5, [#allocation4]   ;;  %v316_v30 = vpop.f32.mrf.mxu1 }
 0x1d1   :  { %421 = dma.done.wait [#allocation4], 128  }
 0x1d2   :  { %422 = vsyncadd [#allocation4], 4294967168 }
 0x1d3   :  { %261 = vsyncpa [#allocation3], 1 }
 0x1d4   :  { %262 = vsyncpa [#allocation6], 1 }
 0x1d5   :  { %263 = vsyncpa [#allocation4], 1 }

// kernel: tpu_custom_call.1
= control target key start
LH: loop header
LB: loop body
LE: loop exit
PB: predicated region body
PF: predicated region fallthrough
CT: control target
= control target key end

     0   :  { %10 = vsyncpa [#allocation3], 0  ;;  %s479_s0 = inlined_call_operand.hbm [shape: f32[8,32], index: 0, kind: input, shape index: {}]   ;;  %s480_s1 = inlined_call_operand.hbm [shape: bf16[32,128], index: 1, kind: input, shape index: {}]   ;;  %s481_s2 = inlined_call_operand.vmem [shape: f32[1,128], index: 2, kind: input, shape index: {}]   ;;  %s482_s3 = inlined_call_operand.hbm [shape: bf16[128,128], index: 3, kind: input, shape index: {}]   ;;  %s483_s4 = inlined_call_operand.vmem [shape: f32[1,128], index: 4, kind: input, shape index: {}]   ;;  %s484_s5 = inlined_call_operand.hbm [shape: f32[8,128], index: 5, kind: output, shape index: {}]  }
   0x1   :  { %11 = vsyncpa [#allocation6], 0 }
   0x2   :  { %12 = vsyncpa [#allocation4], 0  ;;  %s423_s18 = smov [#allocation5]  }
   0x3   :  { %s28_s19 = sshll.u32 %s423_s18, 4  ;;  %s29_s19 = int_to_ptr.vmem [resolvable:$true] %s28_s19 }
   0x4   :  { %s345_s20 = scalar_lea.vmem %s29_s19, 256  ;;  %p350_p1 = scmp.lt.s32.totalorder %s29_s19, %s29_s19 }
   0x5   :  { %p346_p0 = scmp.ne.s32.totalorder %s29_s19, %s345_s20  ;;  %p351_p2 = scmp.lt.s32.totalorder %s345_s20, %s345_s20 }
   0x7   :  { %p352_p3 = por %p351_p2, %p350_p1 }
   0x9   :  { %p353_p4 = pnand %p352_p3, %p346_p0 }
   0xb   :  { %356 = shalt.err (!%p353_p4)
}
   0xc   :  { %s424_s21 = smov 64   ;;  %s425_s22 = smov 4  }
   0xd   :  { %34 = dma.hbm_to_vmem [thread:$0]  %s480_s1, 256, %s29_s19, [#allocation6], %s424_s21, %s424_s21, %s425_s22  }
   0xe   :  { %s426_s25 = smov [#allocation2]   ;;  %s427_s27 = smov [#allocation7]  }
   0xf   :  { %s19_s26 = sshll.u32 %s426_s25, 4  ;;  %s42_s28 = sshll.u32 %s427_s27, 4  ;;  %s20_s26 = int_to_ptr.vmem [resolvable:$true] %s19_s26  ;;  %s43_s28 = int_to_ptr.vmem [resolvable:$true] %s42_s28 }
  0x10   :  { %s365_s29 = scalar_lea.vmem %s20_s26, 128  ;;  %p370_p6 = scmp.lt.s32.totalorder %s20_s26, %s20_s26 }
  0x11   :  { %p366_p5 = scmp.ne.s32.totalorder %s20_s26, %s365_s29  ;;  %p371_p7 = scmp.lt.s32.totalorder %s365_s29, %s365_s29 }
  0x13   :  { %p372_p8 = por %p371_p7, %p370_p6 }
  0x15   :  { %p373_p9 = pnand %p372_p8, %p366_p5 }
  0x17   :  { %376 = shalt.err (!%p373_p9)
}
  0x18   :  { %22 = dma.hbm_to_vmem [thread:$0]  %s479_s0, 128, %s20_s26, [#allocation3]  }
  0x19   :  { %s385_s7 = scalar_lea.vmem %s43_s28, 1024  ;;  %p390_p11 = scmp.lt.s32.totalorder %s43_s28, %s43_s28 }
  0x1a   :  { %p386_p10 = scmp.ne.s32.totalorder %s43_s28, %s385_s7  ;;  %p391_p12 = scmp.lt.s32.totalorder %s385_s7, %s385_s7 }
  0x1c   :  { %p392_p13 = por %p391_p12, %p390_p11 }
  0x1e   :  { %p393_p0 = pnand %p392_p13, %p386_p10 }
  0x20   :  { %396 = shalt.err (!%p393_p0)
}
  0x21   :  { %48 = dma.hbm_to_vmem [thread:$0]  %s482_s3, 1024, %s43_s28, [#allocation6], %s424_s21, %s424_s21, %s425_s22  }
  0x22   :  { %417 = dma.done.wait [#allocation3], 128  }
  0x23   :  { %418 = vsyncadd [#allocation3], 4294967168 }
  0x24   :  { %419 = dma.done.wait [#allocation6], 1280  }
  0x25   :  { %420 = vsyncadd [#allocation6], 4294966016  ;;  %v428_v0 = vmov 0.0   ;;  %vm429_vm0 = vmmov 0   ;;  %v325_v1 = vld [vmem:[#allocation5 + $0x8] sm:$0xff]   ;;  %v326_v2 = vld [vmem:[#allocation5] sm:$0xff]  }
  0x26   :  { %289 = vmatprep.subr.bf16.mxu0 %v428_v0  ;;  %293 = vmatprep.mubr.msk.bf16.mxu0 %vm429_vm0, %v428_v0  ;;  %v61_v3 = vld [vmem:[#allocation2] sm:$0xff]  ;;  %vm86_vm1 = vcmask 261120   ;;  %v327_v4 = vld [vmem:[#allocation7 + $0x38] sm:$0xff]   ;;  %v328_v6 = vld [vmem:[#allocation7 + $0x30] sm:$0xff]   ;;  %s430_s11 = smov [#allocation8]  }
  0x27   :  { %297 = vmatprep.subr.bf16.mxu1 %v428_v0  ;;  %313 = vmatprep.mubr.msk.bf16.mxu1 %vm429_vm0, %v428_v0  ;;  %v62_v5 = vpack.c.bf16 %v61_v3, %v61_v3  ;;  %v329_v7 = vld [vmem:[#allocation7 + $0x28] sm:$0xff]   ;;  %v330_v8 = vld [vmem:[#allocation7 + $0x20] sm:$0xff]   ;;  %v331_v9 = vld [vmem:[#allocation7 + $0x18] sm:$0xff]   ;;  %s254_s12 = sshll.u32 %s430_s11, 4  ;;  %s255_s12 = int_to_ptr.vmem [resolvable:$true] %s254_s12 }
  0x28   :  { %290 = vmatpush3.bf16.msra.mxu0 %v325_v1  ;;  %298 = vmatpush3.bf16.msra.mxu1 %v327_v4  ;;  %v332_v10 = vld [vmem:[#allocation7 + $0x10] sm:$0xff]   ;;  %v333_v11 = vld [vmem:[#allocation7 + $0x8] sm:$0xff]   ;;  %v334_v12 = vld [vmem:[#allocation7] sm:$0xff]   ;;  %p402_p2 = scmp.lt.s32.totalorder %s255_s12, %s255_s12 }
  0x29   :  { %291 = vmatprep.subr.bf16.mxu0 %v428_v0  ;;  %299 = vmatprep.subr.bf16.mxu1 %v428_v0  ;;  %v264_v13 = vld [vmem:[%s481_s2] ss:$0 sm:$0xff]  ;;  %s397_s2 = scalar_lea.vmem %s255_s12, 128 }
  0x2a   :  { %v268_v25 = vld [vmem:[%s483_s4] ss:$0 sm:$0xff]  ;;  %p398_p1 = scmp.ne.s32.totalorder %s255_s12, %s397_s2  ;;  %p403_p3 = scmp.lt.s32.totalorder %s397_s2, %s397_s2 }
  0x2c   :  { %292 = vmatpush3.bf16.msra.mxu0 %v326_v2  ;;  %300 = vmatpush3.bf16.msra.mxu1 %v328_v6  ;;  %p404_p4 = por %p403_p3, %p402_p2 }
  0x2d   :  { %301 = vmatprep.subr.bf16.mxu1 %v428_v0 }
  0x2e   :  { %p405_p5 = pnand %p404_p4, %p398_p1 }
  0x2f   :  { %294 = vmatmul.mubr.msk.bf16.vlgmr.msra.gmra.mxu0 %vm86_vm1, %v62_v5 }
  0x30   :  { %302 = vmatpush3.bf16.msra.mxu1 %v329_v7 }
  0x31   :  { %303 = vmatprep.subr.bf16.mxu1 %v428_v0 }
  0x34   :  { %304 = vmatpush3.bf16.msra.mxu1 %v330_v8 }
  0x35   :  { %305 = vmatprep.subr.bf16.mxu1 %v428_v0 }
  0x38   :  { %306 = vmatpush3.bf16.msra.mxu1 %v331_v9 }
  0x39   :  { %307 = vmatprep.subr.bf16.mxu1 %v428_v0 }
  0x3c   :  { %308 = vmatpush3.bf16.msra.mxu1 %v332_v10 }
  0x3d   :  { %309 = vmatprep.subr.bf16.mxu1 %v428_v0 }
  0x40   :  { %310 = vmatpush3.bf16.msra.mxu1 %v333_v11 }
  0x41   :  { %311 = vmatprep.subr.bf16.mxu1 %v428_v0 }
  0x44   :  { %312 = vmatpush3.bf16.msra.mxu1 %v334_v12 }
  0xef   :  { %v124_v14 = vpop.f32.mrf.mxu0 }
  0xf0   :  { %v125_v15 = vadd.f32 %v264_v13, %v124_v14 }
  0xf1   :  { %v295_v16 = vpop.f32.mrf.mxu0 }
  0xf2   :  { %v130_v17 = vmul.f32 0.5, %v125_v15 }
  0xf3   :  { %v127_v18 = vpop.f32.mrf.mxu0 }
  0xf4   :  { %335 = vtanh.f32 %v130_v17 }
  0xf5   :  { %v296_v19 = vpop.f32.mrf.mxu0 }
 0x101   :  { %v336_v20 = vpop.eup %335 }
 0x102   :  { %v132_v21 = vmul.f32 0.5, %v336_v20 }
 0x104   :  { %v133_v22 = vadd.f32 0.5, %v132_v21 }
 0x106   :  { %v134_v23 = vmul.f32 %v133_v22, %v125_v15 }
 0x108   :  { %v135_v24 = vpack.c.bf16 %v134_v23, %v134_v23 }
 0x10a   :  { %314 = vmatmul.mubr.bf16.vlgmr.msra.gmra.mxu1 %v135_v24 }
 0x1ca   :  { %v241_v26 = vpop.f32.mrf.mxu1 }
 0x1cb   :  { %v242_v27 = vadd.f32 %v268_v25, %v241_v26 }
 0x1cc   :  { %v315_v28 = vpop.f32.mrf.mxu1 }
 0x1cd   :  { %247 = vst [vmem:[#allocation8] sm:$0xff] %v242_v27 }
 0x1ce   :  { %v244_v29 = vpop.f32.mrf.mxu1 }
 0x1cf   :  { %408 = shalt.err (!%p405_p5)
}
 0x1d0   :  { %257 = dma.vmem_to_hbm [thread:$0]  %s255_s12, 128, %s484_s5, [#allocation4]   ;;  %v316_v30 = vpop.f32.mrf.mxu1 }
 0x1d1   :  { %421 = dma.done.wait [#allocation4], 128  }
 0x1d2   :  { %422 = vsyncadd [#allocation4], 4294967168 }
 0x1d3   :  { %261 = vsyncpa [#allocation3], 1 }
 0x1d4   :  { %262 = vsyncpa [#allocation6], 1 }
 0x1d5   :  { %263 = vsyncpa [#allocation4], 1 }

</bundles_post_ra>
